<compile_context>
chip_gen: v7x
topology: tpu7x:2x2x1
jax: 0.10.0
libtpu: 0.0.40
codegen_flags: <defaults>
</compile_context>

<pallas_src>
import jax
import jax.numpy as jnp
from jax.experimental import pallas as pl
from jax.experimental.pallas import tpu as pltpu


# ---------------------------------------------------------------------------
# Pallas kernel: fused 1x1 conv (+ bias) for one (batch, pixel-tile)
# ---------------------------------------------------------------------------
def _bbox_conv1x1_kernel(x_ref, w_ref, b_ref, o_ref):
    # x_ref: (1, C, RT)     channel-major pixel tile (RT pixels of H*W)
    # w_ref: (Cout, C)      1x1 conv weight, PyTorch (Cout, Cin) orientation
    # b_ref: (Cout, 1)      conv bias (f32)
    # o_ref: (1, Cout, RT)  channel-major output tile (lane-dense stores)
    y = jnp.dot(w_ref[...], x_ref[0],                 # (Cout, RT): single MXU matmul,
                preferred_element_type=jnp.float32)   # no in-kernel transpose of x
    y = y + b_ref[...]                                # bias broadcast over lanes (VPU)
    o_ref[...] = y[None].astype(o_ref.dtype)


def _pick_rows_tile(rows, cin, itemsize, max_block_bytes=4 << 20):
    """Multiple-of-128 pixel tile; whole extent only if the map is tiny."""
    if rows < 256:
        # Single tile covering the (possibly unaligned) full pixel extent;
        # "block dim == full array dim" satisfies the (8,128) rule.
        return rows
    # Cap the x block (C * rows_tile * itemsize) so the double-buffered input
    # stays comfortably inside v7x's scoped VMEM, and force >= 2 row tiles so
    # there is always DMA/compute overlap and megacore work to shard.
    cap = (max_block_bytes // max(1, cin * itemsize)) // 128 * 128
    cap = max(128, min(4096, cap))
    half = max(128, (rows // 2) // 128 * 128)
    return min(cap, half)


def bbox_head(x, w, b, *, num_anchors):
    """Fused RetinaFace BboxHead forward.

    x: (N, C, H, W)  NCHW feature map (as in PyTorch)
    w: (num_anchors*4, C) or (num_anchors*4, C, 1, 1)  conv weight (PyTorch layout)
    b: (num_anchors*4,)  conv bias
    returns: (N, H*W*num_anchors, 4)
    """
    N, C, H, W = x.shape
    if w.ndim == 4:  # PyTorch Conv2d weight (Cout, Cin, 1, 1)
        assert w.shape[2:] == (1, 1), w.shape
        w = w.reshape(w.shape[0], w.shape[1])
    Cout, Cin = w.shape
    assert Cin == C and Cout == num_anchors * 4, (w.shape, C, num_anchors)

    rows = H * W
    x_flat = x.reshape(N, C, rows)        # contiguous collapse, no HBM copy
    dtype = x.dtype
    itemsize = jnp.dtype(dtype).itemsize

    rows_tile = _pick_rows_tile(rows, C, itemsize)
    num_tiles = pl.cdiv(rows, rows_tile)

    w_k = w.astype(dtype)                 # bf16 x -> bf16 weights (f32 accumulate)
    b_k = b.reshape(Cout, 1).astype(jnp.float32)

    out_cm = pl.pallas_call(
        _bbox_conv1x1_kernel,
        out_shape=jax.ShapeDtypeStruct((N, Cout, rows), dtype),
        grid=(N, num_tiles),
        in_specs=[
            # Streamed channel-major pixel block.
            pl.BlockSpec((1, C, rows_tile), lambda n, t: (n, 0, t)),
            # Weights / bias: constant index_map -> resident in VMEM.
            pl.BlockSpec((Cout, C), lambda n, t: (0, 0)),
            pl.BlockSpec((Cout, 1), lambda n, t: (0, 0)),
        ],
        out_specs=pl.BlockSpec((1, Cout, rows_tile), lambda n, t: (n, 0, t)),
        compiler_params=pltpu.CompilerParams(
            dimension_semantics=("parallel", "parallel"),
            vmem_limit_bytes=32 << 20),
    )(x_flat, w_k, b_k)

    # (N, Cout, HW) -> (N, HW, Cout) -> (N, HW*A, 4) in plain XLA: reproduces
    # permute(0,2,3,1).contiguous().view(N, -1, 4) on ~Cout/C of the bytes.
    return jnp.transpose(out_cm, (0, 2, 1)).reshape(N, rows * num_anchors, 4)


# ---------------------------------------------------------------------------
# Pure-JAX reference (validates the fused kernel)
# ---------------------------------------------------------------------------
def bbox_head_ref(x, w, b, num_anchors):
    N, C, H, W = x.shape
    if w.ndim == 4:
        w = w.reshape(w.shape[0], w.shape[1])
    y = jnp.einsum("nchw,oc->nhwo", x, w,
                   precision=jax.lax.Precision.HIGHEST) + b
    return y.reshape(N, H * W * num_anchors, 4)


if __name__ == "__main__":
    key = jax.random.PRNGKey(0)

    def run_case(N, C, H, W, num_anchors, case_key):
        kx, kw, kb = jax.random.split(case_key, 3)
        x = jax.random.normal(kx, (N, C, H, W), jnp.float32)
        # PyTorch Conv2d weight layout: (Cout, Cin, 1, 1).
        w = 0.05 * jax.random.normal(kw, (num_anchors * 4, C, 1, 1), jnp.float32)
        b = 0.1 * jax.random.normal(kb, (num_anchors * 4,), jnp.float32)

        out = jax.block_until_ready(bbox_head(x, w, b, num_anchors=num_anchors))
        ref = jax.block_until_ready(bbox_head_ref(x, w, b, num_anchors))

        assert out.shape == (N, H * W * num_anchors, 4), out.shape
        max_err = float(jnp.max(jnp.abs(out - ref)))
        assert jnp.allclose(out, ref, rtol=5e-3, atol=5e-3), max_err

    k1, k2 = jax.random.split(key)
    # Aligned case: 16x16 map -> 2 row tiles of 128 (exercises 2-D parallel grid).
    run_case(2, 128, 16, 16, 3, k1)
    # Ragged FPN-like case: 20x20 = 400 pixels (not a multiple of 128) -> cdiv tail tile.
    run_case(1, 64, 20, 20, 3, k2)

    print("KERNEL_OK")
</pallas_src>

<mosaic_0001>
module attributes {stable_mosaic.version = 11 : i64} {
  func.func @_bbox_conv1x1_kernel(%arg0: i32, %arg1: i32, %arg2: memref<1x128x128xf32, #tpu.memory_space<vmem>>, %arg3: memref<12x128xf32, #tpu.memory_space<vmem>>, %arg4: memref<12x1xf32, #tpu.memory_space<vmem>>, %arg5: memref<1x12x128xf32, #tpu.memory_space<vmem>>) attributes {dimension_semantics = [#tpu.dimension_semantics<parallel>, #tpu.dimension_semantics<parallel>], iteration_bounds = array<i64: 2, 2>, scalar_prefetch = 0 : i64, scratch_operands = 0 : i64, tpu.core_type = #tpu.core_type<tc>, window_params = [{transform_indices = @transform_0, window_bounds = array<i64: 1, 128, 128>}, {pipeline_mode = #tpu.pipeline_mode<synchronous>, transform_indices = @transform_1, window_bounds = array<i64: 12, 128>}, {pipeline_mode = #tpu.pipeline_mode<synchronous>, transform_indices = @transform_2, window_bounds = array<i64: 12, 1>}, {transform_indices = @transform_3, window_bounds = array<i64: 1, 12, 128>}]} {
    %c0 = arith.constant 0 : index
    %c0_0 = arith.constant 0 : index
    %0 = vector.load %arg3[%c0, %c0_0] : memref<12x128xf32, #tpu.memory_space<vmem>>, vector<12x128xf32>
    %c0_1 = arith.constant 0 : index
    %c0_2 = arith.constant 0 : index
    %c0_3 = arith.constant 0 : index
    %1 = vector.load %arg2[%c0_1, %c0_2, %c0_3] : memref<1x128x128xf32, #tpu.memory_space<vmem>>, vector<1x128x128xf32>
    %2 = vector.shape_cast %1 : vector<1x128x128xf32> to vector<128x128xf32>
    %cst = arith.constant dense<0.000000e+00> : vector<12x128xf32>
    %3 = tpu.matmul %0, %2, %cst {dimension_numbers = #tpu.dot_dimension_numbers<[1], [0], [0], [1], [0, 0, 1, 1], [], []>} : vector<12x128xf32>, vector<128x128xf32>, vector<12x128xf32> -> vector<12x128xf32>
    %c0_4 = arith.constant 0 : index
    %c0_5 = arith.constant 0 : index
    %4 = vector.load %arg4[%c0_4, %c0_5] : memref<12x1xf32, #tpu.memory_space<vmem>>, vector<12x1xf32>
    %5 = vector.broadcast %4 : vector<12x1xf32> to vector<12x128xf32>
    %6 = arith.addf %3, %5 : vector<12x128xf32>
    %7 = vector.shape_cast %6 : vector<12x128xf32> to vector<1x12x128xf32>
    %c0_6 = arith.constant 0 : index
    %c0_7 = arith.constant 0 : index
    %c0_8 = arith.constant 0 : index
    %8 = vector.load %arg5[%c0_6, %c0_7, %c0_8] : memref<1x12x128xf32, #tpu.memory_space<vmem>>, vector<1x12x128xf32>
    tpu.vector_store %arg5[%c0_6, %c0_7, %c0_8], %7 {strides = array<i32>} : memref<1x12x128xf32, #tpu.memory_space<vmem>>, vector<1x12x128xf32>,
    return
  }
  func.func @transform_0(%arg0: i32, %arg1: i32) -> (i32, i32, i32) {
    %c0_i32 = arith.constant 0 : i32
    %c0_i32_0 = arith.constant 0 : i32
    return %arg0, %c0_i32, %arg1 : i32, i32, i32
  }
  func.func @transform_1(%arg0: i32, %arg1: i32) -> (i32, i32) {
    %c0_i32 = arith.constant 0 : i32
    %c0_i32_0 = arith.constant 0 : i32
    %c0_i32_1 = arith.constant 0 : i32
    return %c0_i32, %c0_i32_0 : i32, i32
  }
  func.func @transform_2(%arg0: i32, %arg1: i32) -> (i32, i32) {
    %c0_i32 = arith.constant 0 : i32
    %c0_i32_0 = arith.constant 0 : i32
    %c0_i32_1 = arith.constant 0 : i32
    return %c0_i32, %c0_i32_0 : i32, i32
  }
  func.func @transform_3(%arg0: i32, %arg1: i32) -> (i32, i32, i32) {
    %c0_i32 = arith.constant 0 : i32
    %c0_i32_0 = arith.constant 0 : i32
    return %arg0, %c0_i32, %arg1 : i32, i32, i32
  }
}

</mosaic_0001>

<bundles_post_ra>
// kernel: tpu_custom_call.1
= control target key start
LH: loop header
LB: loop body
LE: loop exit
PB: predicated region body
PF: predicated region fallthrough
CT: control target
= control target key end

     0   :  { %8 = vsyncpa [#allocation3], 0  ;;  %s928_s0 = inlined_call_operand.hbm [shape: f32[2,128,256], index: 0, kind: input, shape index: {}]   ;;  %s929_s1 = inlined_call_operand.vmem [shape: f32[12,128], index: 1, kind: input, shape index: {}]   ;;  %s930_s2 = inlined_call_operand.vmem [shape: f32[12,1], index: 2, kind: input, shape index: {}]   ;;  %s931_s3 = inlined_call_operand.vmem [shape: f32[2,12,256], index: 3, kind: output, shape index: {}]  }
   0x1   :  { %10 = vsyncpa [#allocation3 + $0x1], 0  ;;  %s732_s12 = smov 0   ;;  %s734_s13 = smov 0  }
   0x2   :  { %s736_s14 = smov 0   ;;  %s738_s15 = smov 0  }
   0x3   :  { %s740_s16 = smov 0   ;;  %s742_s17 = smov 0  }
   0x4   :  { %s744_s18 = smov 0   ;;  %s746_s19 = smov 0  }
   0x5 LB: > { %s433_s20 = sadd.s32 4294967295, %s705_s19   ;;  %s25_s21 = sadd.s32 1, %s697_s17  ;;  %s705_s19 = sphi %s746_s19, %s16_s19   ;;  %s701_s18 = sphi %s744_s18, %s944_s18   ;;  %s697_s17 = sphi %s742_s17, %s943_s17   ;;  %s693_s16 = sphi %s740_s16, %s942_s16   ;;  %s689_s15 = sphi %s738_s15, %s941_s15   ;;  %s685_s14 = sphi %s736_s14, %s940_s14   ;;  %s681_s13 = sphi %s734_s13, %s939_s13   ;;  %s677_s12 = sphi %s732_s12, %s938_s12  }
   0x6   : > { %p26_p0 = scmp.ge.s32.totalorder %s25_s21, 2  ;;  %s28_s22 = sadd.s32 1, %s701_s18 }
   0x7   : > { %s37_s23 = sadd.s32 1, %s685_s14  ;;  %p44_p1 = scmp.ne.s32.totalorder %s685_s14, %s681_s13 }
   0x8   : > { %s946_s21 = smov (%p26_p0, %s25_s21), 0  ;;  %s948_s22 = smov (!%p26_p0, %s28_s22), %s701_s18 }
   0x9   : > { %s33_s24 = ssub.s32 %s697_s17, %s946_s21  ;;  %p45_p2 = scmp.eq.s32.totalorder %s705_s19, 0 }
   0xa   : > { %p30_p3 = scmp.ge.s32.totalorder %s948_s22, 2  ;;  %p50_p4 = scmp.ne.s32.totalorder %s681_s13, %s677_s12 }
   0xb   : > { %p786_p5 = por %p45_p2, %p44_p1  ;;  %p51_p6 = scmp.eq.s32.totalorder %s433_s20, 0 }
   0xc   : > { %s950_s22 = smov (%p30_p3, %s948_s22), 0  ;;  %p118_p8 = scmp.eq.s32.totalorder %s433_s20, 3 }
   0xd   : > { %p792_p7 = por %p51_p6, %p50_p4  ;;  %s32_s27 = ssub.s32 %s701_s18, %s950_s22 }
   0xe   : > { %s34_s28 = sor.u32 %s33_s24, %s32_s27  ;;  %p801_p9 = por %p118_p8, %p44_p1 }
   0xf   : > { %p35_p10 = scmp.eq.s32.totalorder %s34_s28, 0  ;;  %p539_p11 = scmp.lt.s32.totalorder %s705_s19, 4 }
  0x10   : > { %s934_s29 = scalar_select %p801_p9, 1, 0 }
  0x11   : > { %s150_s30 = sand.u32 1, %s685_s14   ;;  %s438_s4 = sshll.u32 %s701_s18, 5 }
  0x12   : > { %s809_s5 = scalar_select %p35_p10, %s685_s14, %s37_s23  }
  0x13   : > { %s437_s6 = sshll.u32 %s150_s30, 7  ;;  %s159_s7 = sadd.s32 %s697_s17, %s438_s4 }
  0x14   : > { %s439_s8 = sshll.u32 %s159_s7, 7  ;;  %s154_s9 = scalar_lea.vmem [#allocation2], %s437_s6 }
  0x15   : > { %s162_s10 = sshll.u32 %s154_s9, 4  ;;  %s815_s20 = scalar_lea.hbm %s928_s0, %s439_s8  ;;  %s817_s10 = int_to_ptr.vmem [resolvable:$true] %s162_s10 }
  0x16   : > { %p821_p12 = pnand %p539_p11, %p786_p5  ;;  %s826_s24 = scalar_lea.sflag [#allocation3], %s150_s30 }
  0x17   : > { %s609_s27 = scalar_lea.hbm %s815_s20, 2048  ;;  %s614_s25 = scalar_lea.hbm %s928_s0, 8192 }
  0x18   : > { %p610_p0 = scmp.ne.s32.totalorder %s815_s20, %s609_s27  ;;  %p611_p1 = pneg %p821_p12 }
  0x19   : > { %p615_p4 = scmp.lt.u32.totalorder %s815_s20, %s928_s0  ;;  %p616_p5 = scmp.lt.u32.totalorder %s614_s25, %s609_s27 }
  0x1a   : > { %p612_p2 = pnand %p611_p1, %p610_p0  ;;  %p618_p8 = scmp.lt.u32.totalorder %s609_s27, %s815_s20 }
  0x1b   : > { %p617_p6 = por %p616_p5, %p615_p4 }
  0x1c   : > { %p613_p3 = pneg %p612_p2 }
  0x1d   : > { %p619_p10 = por %p618_p8, %p617_p6 }
  0x1f   : > { %p620_p11 = pnand %p619_p10, %p613_p3 }
  0x21   : > { %623 = shalt.err (!%p620_p11)
}
  0x22   : > { %s624_s30 = scalar_lea.vmem %s817_s10, 2048  ;;  %s707_s8 = smov [#allocation2]  }
  0x23   : > { %p625_p0 = scmp.ne.s32.totalorder %s817_s10, %s624_s30  ;;  %s629_s9 = sshll.u32 %s707_s8, 4  ;;  %s630_s9 = int_to_ptr.vmem [resolvable:$false] %s629_s9 }
  0x24   : > { %s631_s11 = scalar_lea.vmem %s630_s9, 4096  ;;  %p632_p9 = scmp.lt.s32.totalorder %s817_s10, %s630_s9 }
  0x25   : > { %p627_p2 = pnand %p625_p0, %p611_p1  ;;  %p633_p4 = scmp.lt.s32.totalorder %s631_s11, %s624_s30 }
  0x27   : > { %p628_p13 = pneg %p627_p2  ;;  %p634_p5 = por %p633_p4, %p632_p9 }
  0x29   : > { %p635_p6 = pnand %p634_p5, %p628_p13 }
  0x2b   : > { %638 = shalt.err (!%p635_p6)
}
  0x2c   : > { %s708_s12 = smov 256   ;;  %s709_s27 = smov 128  }
  0x2d   : > { %s710_s28 = smov 8   ;;  %p170_p1 = scmp.lt.s32.totalorder %s705_s19, 5 }
  0x2e   : > { %538 = dma.hbm_to_vmem [thread:$0]  (!%p821_p12), %s815_s20, 2048, %s817_s10, %s826_s24, %s708_s12, %s709_s27, %s710_s28  }
  0x2f   : > { %p936_p3 = scmp.ge.s32.totalorder %s705_s19, 1 }
  0x31   : > { %p171_p8 = pnand %p936_p3, %p170_p1 }
  0x32   : > { %s858_s4 = sand.u32 (!%p171_p8), 1, %s681_s13  }
  0x33   : > { %174 = sbr.rel (%p171_p8) target bundleno = 318 (0x13e), region = 32  ;;  %s441_s25 = sshll.u32 (!%p171_p8), %s858_s4, 7 }
  0x34   : > { %s177_s6 = scalar_lea.sflag (!%p171_p8), [#allocation3], %s858_s4  ;;  %s862_s7 = scalar_lea.vmem (!%p171_p8), [#allocation2], %s441_s25 }
  0x3a   : > { %672 = dma.done.wait (%p792_p7), %s177_s6, 2048  }
  0x3b   : > { %674 = vsyncadd (%p792_p7), %s177_s6, 4294965248  ;;  %v711_v0 = vmov 0   ;;  %v204_v1 = vld [vmem:[%s862_s7] sm:$0xff]  ;;  %v205_v2 = vld [vmem:[%s862_s7 + $0x8] sm:$0xff]  ;;  %s442_s11 = sshll.u32 %s858_s4, 4  ;;  %p937_p7 = scmp.ne.s32.totalorder %s934_s29, 0 }
  0x3c   : > { %608 = vset.pattern.permute.xlu0 %v711_v0  ;;  %v206_v3 = vld [vmem:[%s862_s7 + $0x10] sm:$0xff]  ;;  %v501_v4 = vpack.c.bf16 %v205_v2, %v204_v1  ;;  %v207_v5 = vld [vmem:[%s862_s7 + $0x18] sm:$0xff]  ;;  %v208_v7 = vld [vmem:[%s862_s7 + $0x20] sm:$0xff]  ;;  %s201_s12 = scalar_lea.vmem [#allocation4], %s442_s11  ;;  %s444_s27 = sshll.u32 (%p937_p7), %s693_s16, 2 }
  0x3d   : > { %v505_v6 = vpack.c.bf16 %v207_v5, %v206_v3  ;;  %v209_v8 = vld [vmem:[%s862_s7 + $0x28] sm:$0xff]  ;;  %v202_v10 = vld [vmem:[%s929_s1] sm:$0xff]  ;;  %v210_v11 = vld [vmem:[%s862_s7 + $0x30] sm:$0xff]  ;;  %s317_s28 = sadd.s32 (%p937_p7), %s689_s15, %s444_s27 }
  0x3e   : > { %502 = vmatprep.subr.bf16.mxu0 %v501_v4  ;;  %v509_v9 = vpack.c.bf16 %v209_v8, %v208_v7  ;;  %v211_v12 = vld [vmem:[%s862_s7 + $0x38] sm:$0xff]  ;;  %498 = vmatprep.mubr.f32.mxu0 %v202_v10  ;;  %v220_v13 = vld [vmem:[%s930_s2] sm:$0xff]  ;;  %v221_v14 = vld [vmem:[%s930_s2 + $0x8] sm:$0xf]  ;;  %s445_s25 = sshll.u32 (%p937_p7), %s317_s28, 3 }
  0x3f   : > { %504 = vmatpush3.bf16.msra.mxu0 %v501_v4  ;;  %224 = vperm.xlu0 %608, %v220_v13   ;;  %v513_v15 = vpack.c.bf16 %v211_v12, %v210_v11  ;;  %v212_v16 = vld [vmem:[%s862_s7 + $0x40] sm:$0xff]  ;;  %v213_v17 = vld [vmem:[%s862_s7 + $0x48] sm:$0xff]  ;;  %v214_v19 = vld [vmem:[%s862_s7 + $0x50] sm:$0xff] }
  0x40   : > { %506 = vmatprep.subr.bf16.mxu0 %v505_v6  ;;  %v517_v18 = vpack.c.bf16 %v213_v17, %v212_v16  ;;  %v215_v20 = vld [vmem:[%s862_s7 + $0x58] sm:$0xff]  ;;  %v216_v22 = vld [vmem:[%s862_s7 + $0x60] sm:$0xff]  ;;  %v217_v23 = vld [vmem:[%s862_s7 + $0x68] sm:$0xff] }
  0x41   : > { %v521_v21 = vpack.c.bf16 %v215_v20, %v214_v19  ;;  %v525_v24 = vpack.c.bf16 %v217_v23, %v216_v22  ;;  %v218_v25 = vld [vmem:[%s862_s7 + $0x70] sm:$0xff]  ;;  %v219_v26 = vld [vmem:[%s862_s7 + $0x78] sm:$0xff]  ;;  %v203_v28 = vld [vmem:[%s929_s1 + $0x8] sm:$0xf]  ;;  %s319_s7 = scalar_lea.vmem (%p937_p7), %s931_s3, %s445_s25 }
  0x42   : > { %v529_v27 = vpack.c.bf16 %v219_v26, %v218_v25 }
  0x43   : > { %508 = vmatpush3.bf16.msra.mxu0 %v505_v6  ;;  %229 = vperm.xlu0 %608, %v221_v14  }
  0x44   : > { %510 = vmatprep.subr.bf16.mxu0 %v509_v9 }
  0x47   : > { %512 = vmatpush3.bf16.msra.mxu0 %v509_v9 }
  0x48   : > { %514 = vmatprep.subr.bf16.mxu0 %v513_v15 }
  0x4b   : > { %516 = vmatpush3.bf16.msra.mxu0 %v513_v15 }
  0x4c   : > { %518 = vmatprep.subr.bf16.mxu0 %v517_v18 }
  0x4f   : > { %520 = vmatpush3.bf16.msra.mxu0 %v517_v18 }
  0x50   : > { %522 = vmatprep.subr.bf16.mxu0 %v521_v21 }
  0x53   : > { %524 = vmatpush3.bf16.msra.mxu0 %v521_v21 }
  0x54   : > { %526 = vmatprep.subr.bf16.mxu0 %v525_v24 }
  0x57   : > { %528 = vmatpush3.bf16.msra.mxu0 %v525_v24 }
  0x58   : > { %530 = vmatprep.subr.bf16.mxu0 %v529_v27 }
  0x5b   : > { %532 = vmatpush3.bf16.msra.mxu0 %v529_v27 }
  0x5e   : > { %499 = vmatmul.mubr.f32.vlgmr.msra.gmra.mrb[0].mxu0 %v203_v28 }
  0xbe   : > { %v225_v29 = vpop.permute.xlu0 %224 }
  0xc2   : > { %v230_v30 = vpop.permute.xlu0 %229 }
 0x12f   : > { %315 = sbr.rel (!%p937_p7) target bundleno = 318 (0x13e), region = 40 }
 0x131   : > { %v500_v31 = vpop.f32.mrb[0].mxu0 }
 0x132   : > { %v304_v32 = vadd.f32 %v500_v31, %v230_v30  ;;  %v298_v33 = vpop.f32.mrb[1].mxu0 }
 0x133   : > { %v299_v34 = vadd.f32 %v298_v33, %v225_v29 }
 0x134   : > { %308 = vst [vmem:[%s201_s12 + $0x8] sm:$0xf] %v304_v32 }
 0x135   : > { %307 = vst [vmem:[%s201_s12] sm:$0xff] %v299_v34 }
 0x13b   : > { %v351_v36 = vld [vmem:[%s201_s12 + $0x8] sm:$0xff] }
 0x13c   : > { %v349_v35 = vld [vmem:[%s201_s12] sm:$0xff]  ;;  %352 = vst [vmem:[%s319_s7 + $0x10] sm:$0xff] %v351_v36 }
 0x13d   : > { %350 = vst [vmem:[%s319_s7] sm:$0xff] %v349_v35 }
 0x13e PF: > { %s16_s19 = sadd.s32 1, %s705_s19   ;;  %s938_s12 = smov %s681_s13 }
 0x13f   : > { %p13_p9 = scmp.ge.s32.totalorder %s16_s19, 6   ;;  %s939_s13 = smov %s685_s14 }
 0x140   : > { %s940_s14 = smov %s809_s5  ;;  %s941_s15 = smov %s697_s17 }
 0x141   : > { %s942_s16 = smov %s701_s18  ;;  %s943_s17 = smov %s946_s21 }
 0x142   : > { %s944_s18 = smov %s950_s22  ;;  %15 = sbr.rel (!%p13_p9) target bundleno = 5 (0x5), region = 110 }
 0x149   :  { %368 = vsyncpa [#allocation3], 1 }
 0x14a   :  { %370 = vsyncpa [#allocation3 + $0x1], 1 }

</bundles_post_ra>
